<compile_context>
chip_gen: v5e
topology: v5e:2x2
jax: 0.10.0
libtpu: 0.0.40
codegen_flags: <defaults>
</compile_context>

<pallas_src>
import jax
import jax.numpy as jnp
from jax.experimental import pallas as pl
from jax.experimental.pallas import tpu as pltpu


_LANE_CANDIDATES = (1024, 512, 256, 128)
_BLOCK_BUDGET_BYTES = 4 << 20     # ~4 MiB input block -> 2x(in+out) = 16 MiB double-buffered
_VMEM_LIMIT_BYTES = 32 << 20      # safe on v5e/v6e (128 MiB phys) and v7x (64 MiB phys)
_MIN_GRID_STEPS = 4               # keep both v7x TensorCores fed + pipeline overlap


def _cdiv(a, b):
    return -(-a // b)


def _round_up(a, m):
    return _cdiv(a, m) * m


def _color_shift_kernel(w_ref, x_ref, o_ref):
    # w_ref: SMEM (3,) f32, pre-normalized channel weights (w / sum(w)).
    # x_ref: VMEM (Nb, 3, Tr, L) input slab (channel axis is a leading, untiled dim).
    # o_ref: VMEM (Nb, 3, Tr, L) output slab (gray replicated over the 3 channels).
    w0 = w_ref[0]
    w1 = w_ref[1]
    w2 = w_ref[2]

    x0 = x_ref[:, 0, :, :].astype(jnp.float32)   # (Nb, Tr, L)
    x1 = x_ref[:, 1, :, :].astype(jnp.float32)
    x2 = x_ref[:, 2, :, :].astype(jnp.float32)

    gray = (x0 * w0 + x1 * w1 + x2 * w2).astype(o_ref.dtype)  # (Nb, Tr, L)

    # Three plain full-slab stores (channel axis is leading/untiled -> lane-dense).
    o_ref[:, 0, :, :] = gray
    o_ref[:, 1, :, :] = gray
    o_ref[:, 2, :, :] = gray


def _choose_lane_width(hw):
    """Pick lane width L. Prefer an L that divides hw (no pad/slice HBM passes)."""
    divisible = [L for L in _LANE_CANDIDATES if hw % L == 0]
    for L in divisible:
        if hw // L >= 8:          # keep >= 8 rows so sublanes stay dense
            return L
    if divisible:
        return divisible[-1]      # thumbnails: smallest divisible L maximizes rows
    return 128                    # last resort: pad hw up to a multiple of 128


def _choose_tiling(N, hw, itemsize):
    """Pick (L, Tr, n_sp, hw_pad, Nb) for lane-dense, ~4 MiB, multi-step tiling."""
    L = _choose_lane_width(hw)
    r = _cdiv(hw, L)              # rows per image (after possible lane padding)
    hw_pad = r * L

    # Rows per block from the VMEM budget (multiple of 8 -> dense sublanes).
    row_budget = max(8, (_BLOCK_BUDGET_BYTES // (3 * L * itemsize)) // 8 * 8)

    if r <= row_budget:
        Tr, n_sp = r, 1           # full-extent row dim (legal for any r, incl. r < 8)
    else:
        Tr, n_sp = row_budget, _cdiv(r, row_budget)

    # If the batch alone can't feed the grid, split the row axis so the 'parallel'
    # grid has at least _MIN_GRID_STEPS steps (v7x megacore sharding + overlap).
    if N * n_sp < _MIN_GRID_STEPS and r >= 2 * 8:
        want = _cdiv(_MIN_GRID_STEPS, N)
        Tr = min(row_budget, max(8, _round_up(_cdiv(r, want), 8)))
        n_sp = _cdiv(r, Tr)       # final spatial block may be ragged -> masked by Pallas

    # Fold several small images into one block so each grid step moves a decent
    # amount of data, but never shrink the grid below _MIN_GRID_STEPS.
    Nb = 1
    if n_sp == 1 and N > 1:
        per_image = 3 * Tr * L * itemsize
        Nb = min(N,
                 max(1, _BLOCK_BUDGET_BYTES // per_image),
                 max(1, N // _MIN_GRID_STEPS))
    return L, Tr, n_sp, hw_pad, Nb


def _color_shift_one(weights_norm, x):
    N, C, H, W = x.shape
    assert C == 3, "ColorShift expects 3-channel (RGB) NCHW inputs"
    hw = H * W
    itemsize = jnp.dtype(x.dtype).itemsize
    L, Tr, n_sp, hw_pad, Nb = _choose_tiling(N, hw, itemsize)
    r = hw_pad // L

    x_flat = x.reshape(N, C, hw)
    if hw_pad != hw:
        # Last resort only (hw not a multiple of 128): one pad pass + one slice pass.
        x_flat = jnp.pad(x_flat, ((0, 0), (0, 0), (0, hw_pad - hw)))
    x4 = x_flat.reshape(N, C, r, L)

    grid = (_cdiv(N, Nb), n_sp)   # cdiv grid: ragged final batch/row blocks are masked
    bytes_accessed = 2 * N * 3 * hw_pad * itemsize   # 3 reads + 3 writes per pixel

    out4 = pl.pallas_call(
        _color_shift_kernel,
        out_shape=jax.ShapeDtypeStruct((N, 3, r, L), x.dtype),
        grid=grid,
        in_specs=[
            pl.BlockSpec(memory_space=pltpu.MemorySpace.SMEM),           # (3,) f32 weights
            pl.BlockSpec((Nb, 3, Tr, L), lambda n, s: (n, 0, s, 0)),     # input slab
        ],
        out_specs=pl.BlockSpec((Nb, 3, Tr, L), lambda n, s: (n, 0, s, 0)),
        compiler_params=pltpu.CompilerParams(
            dimension_semantics=("parallel", "parallel"),
            vmem_limit_bytes=_VMEM_LIMIT_BYTES),
        cost_estimate=pl.CostEstimate(
            flops=5 * N * hw_pad, transcendentals=0, bytes_accessed=bytes_accessed),
    )(weights_norm, x4)

    out = out4.reshape(N, 3, hw_pad)
    if hw_pad != hw:
        out = out[:, :, :hw]
    return out.reshape(N, 3, H, W)


def sample_uniform_weights(key):
    """Replicates torch.distributions.Uniform(low, high).sample() for mode='uniform'."""
    low = jnp.asarray((0.199, 0.487, 0.014), dtype=jnp.float32)
    high = jnp.asarray((0.399, 0.687, 0.214), dtype=jnp.float32)
    u = jax.random.uniform(key, (3,), dtype=jnp.float32)
    return low + u * (high - low)


def color_shift(key, *image_batches):
    """Forward pass of ColorShift(mode='uniform'). Returns one output per input batch."""
    weights = sample_uniform_weights(key)
    weights_norm = weights / jnp.sum(weights)   # hoist the /sum(w) out of the kernel
    return tuple(_color_shift_one(weights_norm, x) for x in image_batches)


def _reference(weights, x):
    w = weights.astype(jnp.float32)
    xf = x.astype(jnp.float32)
    gray = jnp.sum(xf * w[None, :, None, None], axis=1) / jnp.sum(w)
    return jnp.repeat(gray[:, None, :, :], 3, axis=1).astype(x.dtype)


if __name__ == "__main__":
    root = jax.random.PRNGKey(0)
    k_w, k_a, k_b, k_c, k_d, k_e = jax.random.split(root, 6)

    # Shapes chosen to exercise every tiling path:
    #   a: thumbnail, L=128 fallback           b: hw % 128 != 0 -> pad/slice last resort
    #   c: row-axis split for >=4 grid steps   d: ragged (masked) final spatial block
    #   e: batch folding with ragged final batch block (N=13, Nb=3)
    xa = jax.random.uniform(k_a, (2, 3, 16, 16), dtype=jnp.float32)
    xb = jax.random.uniform(k_b, (2, 3, 40, 40), dtype=jnp.float32)
    xc = jax.random.uniform(k_c, (2, 3, 128, 128), dtype=jnp.float32)
    xd = jax.random.uniform(k_d, (2, 3, 128, 192), dtype=jnp.float32)
    xe = jax.random.uniform(k_e, (13, 3, 16, 16), dtype=jnp.float32)

    inputs = (xa, xb, xc, xd, xe)
    outs = color_shift(k_w, *inputs)
    outs = jax.tree_util.tree_map(jax.block_until_ready, outs)

    # Verify against a pure-JAX reference of the PyTorch forward.
    weights = sample_uniform_weights(k_w)
    for x, o in zip(inputs, outs):
        ref = _reference(weights, x)
        assert o.shape == ref.shape and o.dtype == ref.dtype
        err = jnp.max(jnp.abs(o.astype(jnp.float32) - ref.astype(jnp.float32)))
        assert err < 1e-5, f"max abs err {err} for shape {x.shape}"

    print("KERNEL_OK")
</pallas_src>

<mosaic_0001>
module attributes {stable_mosaic.version = 11 : i64} {
  func.func @_color_shift_kernel(%arg0: i32, %arg1: i32, %arg2: memref<3xf32, #tpu.memory_space<smem>>, %arg3: memref<1x3x2x128xf32, #tpu.memory_space<vmem>>, %arg4: memref<1x3x2x128xf32, #tpu.memory_space<vmem>>) attributes {dimension_semantics = [#tpu.dimension_semantics<parallel>, #tpu.dimension_semantics<parallel>], iteration_bounds = array<i64: 2, 1>, scalar_prefetch = 0 : i64, scratch_operands = 0 : i64, tpu.core_type = #tpu.core_type<tc>, window_params = [{transform_indices = @transform_0, window_bounds = array<i64: 3>}, {transform_indices = @transform_1, window_bounds = array<i64: 1, 3, 2, 128>}, {transform_indices = @transform_2, window_bounds = array<i64: 1, 3, 2, 128>}]} {
    %c0 = arith.constant 0 : index
    %0 = memref.load %arg2[%c0] : memref<3xf32, #tpu.memory_space<smem>>
    %c1 = arith.constant 1 : index
    %1 = memref.load %arg2[%c1] : memref<3xf32, #tpu.memory_space<smem>>
    %c2 = arith.constant 2 : index
    %2 = memref.load %arg2[%c2] : memref<3xf32, #tpu.memory_space<smem>>
    %c0_0 = arith.constant 0 : index
    %c0_1 = arith.constant 0 : index
    %c0_2 = arith.constant 0 : index
    %c0_3 = arith.constant 0 : index
    %3 = vector.load %arg3[%c0_0, %c0_1, %c0_2, %c0_3] : memref<1x3x2x128xf32, #tpu.memory_space<vmem>>, vector<1x1x2x128xf32>
    %4 = vector.shape_cast %3 : vector<1x1x2x128xf32> to vector<1x2x128xf32>
    %c0_4 = arith.constant 0 : index
    %c1_5 = arith.constant 1 : index
    %c0_6 = arith.constant 0 : index
    %c0_7 = arith.constant 0 : index
    %5 = vector.load %arg3[%c0_4, %c1_5, %c0_6, %c0_7] : memref<1x3x2x128xf32, #tpu.memory_space<vmem>>, vector<1x1x2x128xf32>
    %6 = vector.shape_cast %5 : vector<1x1x2x128xf32> to vector<1x2x128xf32>
    %c0_8 = arith.constant 0 : index
    %c2_9 = arith.constant 2 : index
    %c0_10 = arith.constant 0 : index
    %c0_11 = arith.constant 0 : index
    %7 = vector.load %arg3[%c0_8, %c2_9, %c0_10, %c0_11] : memref<1x3x2x128xf32, #tpu.memory_space<vmem>>, vector<1x1x2x128xf32>
    %8 = vector.shape_cast %7 : vector<1x1x2x128xf32> to vector<1x2x128xf32>
    %9 = vector.broadcast %0 : f32 to vector<1x2x128xf32>
    %10 = arith.mulf %4, %9 : vector<1x2x128xf32>
    %11 = vector.broadcast %1 : f32 to vector<1x2x128xf32>
    %12 = arith.mulf %6, %11 : vector<1x2x128xf32>
    %13 = arith.addf %10, %12 : vector<1x2x128xf32>
    %14 = vector.broadcast %2 : f32 to vector<1x2x128xf32>
    %15 = arith.mulf %8, %14 : vector<1x2x128xf32>
    %16 = arith.addf %13, %15 : vector<1x2x128xf32>
    %c0_12 = arith.constant 0 : index
    %c0_13 = arith.constant 0 : index
    %c0_14 = arith.constant 0 : index
    %c0_15 = arith.constant 0 : index
    %17 = vector.load %arg4[%c0_12, %c0_13, %c0_14, %c0_15] : memref<1x3x2x128xf32, #tpu.memory_space<vmem>>, vector<1x1x2x128xf32>
    %18 = vector.shape_cast %17 : vector<1x1x2x128xf32> to vector<1x2x128xf32>
    %19 = vector.shape_cast %16 : vector<1x2x128xf32> to vector<1x1x2x128xf32>
    tpu.vector_store %arg4[%c0_12, %c0_13, %c0_14, %c0_15], %19 {strides = array<i32>} : memref<1x3x2x128xf32, #tpu.memory_space<vmem>>, vector<1x1x2x128xf32>,
    %c0_16 = arith.constant 0 : index
    %c1_17 = arith.constant 1 : index
    %c0_18 = arith.constant 0 : index
    %c0_19 = arith.constant 0 : index
    %20 = vector.load %arg4[%c0_16, %c1_17, %c0_18, %c0_19] : memref<1x3x2x128xf32, #tpu.memory_space<vmem>>, vector<1x1x2x128xf32>
    %21 = vector.shape_cast %20 : vector<1x1x2x128xf32> to vector<1x2x128xf32>
    %22 = vector.shape_cast %16 : vector<1x2x128xf32> to vector<1x1x2x128xf32>
    tpu.vector_store %arg4[%c0_16, %c1_17, %c0_18, %c0_19], %22 {strides = array<i32>} : memref<1x3x2x128xf32, #tpu.memory_space<vmem>>, vector<1x1x2x128xf32>,
    %c0_20 = arith.constant 0 : index
    %c2_21 = arith.constant 2 : index
    %c0_22 = arith.constant 0 : index
    %c0_23 = arith.constant 0 : index
    %23 = vector.load %arg4[%c0_20, %c2_21, %c0_22, %c0_23] : memref<1x3x2x128xf32, #tpu.memory_space<vmem>>, vector<1x1x2x128xf32>
    %24 = vector.shape_cast %23 : vector<1x1x2x128xf32> to vector<1x2x128xf32>
    %25 = vector.shape_cast %16 : vector<1x2x128xf32> to vector<1x1x2x128xf32>
    tpu.vector_store %arg4[%c0_20, %c2_21, %c0_22, %c0_23], %25 {strides = array<i32>} : memref<1x3x2x128xf32, #tpu.memory_space<vmem>>, vector<1x1x2x128xf32>,
    return
  }
  func.func @transform_0(%arg0: i32, %arg1: i32) -> i32 {
    %c0_i32 = arith.constant 0 : i32
    %c0_i32_0 = arith.constant 0 : i32
    return %c0_i32 : i32
  }
  func.func @transform_1(%arg0: i32, %arg1: i32) -> (i32, i32, i32, i32) {
    %c0_i32 = arith.constant 0 : i32
    %c0_i32_0 = arith.constant 0 : i32
    %c0_i32_1 = arith.constant 0 : i32
    return %arg0, %c0_i32, %arg1, %c0_i32_0 : i32, i32, i32, i32
  }
  func.func @transform_2(%arg0: i32, %arg1: i32) -> (i32, i32, i32, i32) {
    %c0_i32 = arith.constant 0 : i32
    %c0_i32_0 = arith.constant 0 : i32
    %c0_i32_1 = arith.constant 0 : i32
    return %arg0, %c0_i32, %arg1, %c0_i32_0 : i32, i32, i32, i32
  }
}

</mosaic_0001>

<bundles_post_ra>
// kernel: tpu_custom_call.1
= control target key start
LH: loop header
LB: loop body
LE: loop exit
PB: predicated region body
PF: predicated region fallthrough
CT: control target
= control target key end

     0   :  { %7 = vsyncpa [#allocation5], 0  ;;  %s732_s0 = inlined_call_operand.hbm [shape: f32[3], index: 0, kind: input, shape index: {}]   ;;  %s733_s1 = inlined_call_operand.hbm [shape: f32[2,3,2,128], index: 1, kind: input, shape index: {}]   ;;  %s734_s2 = inlined_call_operand.hbm [shape: f32[2,3,2,128], index: 2, kind: output, shape index: {}]  }
   0x1   :  { %8 = vsyncpa [#allocation3], 0 }
   0x2   :  { %10 = vsyncpa [#allocation3 + $0x1], 0 }
   0x3   :  { %11 = vsyncpa [#allocation4], 0 }
   0x4   :  { %13 = vsyncpa [#allocation4 + $0x1], 0  ;;  %s581_s9 = smov 0   ;;  %s583_s10 = smov 0  }
   0x5   :  { %s585_s11 = smov 0   ;;  %s587_s12 = smov 0  }
   0x6   :  { %s589_s13 = smov 0   ;;  %s591_s14 = smov 0  }
   0x7 LB: > { %s330_s15 = sadd.s32 4294967295, %s559_s14   ;;  %s331_s16 = sadd.s32 4294967294, %s559_s14   ;;  %s559_s14 = sphi %s591_s14, %s19_s14   ;;  %s555_s13 = sphi %s589_s13, %s746_s13   ;;  %s551_s12 = sphi %s587_s12, %s745_s12   ;;  %s547_s11 = sphi %s585_s11, %s744_s11   ;;  %s543_s10 = sphi %s583_s10, %s743_s10   ;;  %s539_s9 = sphi %s581_s9, %s742_s9  }
   0x8   : > { %s61_s17 = sadd.s32 1, %s547_s11  ;;  %p68_p0 = scmp.ne.s32.totalorder %s547_s11, %s543_s10 }
   0x9   : > { %p69_p1 = scmp.eq.s32.totalorder %s559_s14, 0  ;;  %p74_p2 = scmp.ne.s32.totalorder %s543_s10, %s539_s9 }
   0xa   : > { %p619_p3 = scmp.eq.s32.totalorder %s330_s15, 0  ;;  %p100_p4 = scmp.eq.s32.totalorder %s330_s15, 1 }
   0xb   : > { %p623_p5 = por %p69_p1, %p68_p0  ;;  %p106_p6 = scmp.eq.s32.totalorder %s331_s16, 1 }
   0xc   : > { %p629_p7 = por %p619_p3, %p74_p2  ;;  %p633_p8 = por %p100_p4, %p68_p0 }
   0xd   : > { %p637_p9 = por %p106_p6, %p74_p2  ;;  %p332_p10 = scmp.ge.s32.totalorder %s559_s14, 1 }
   0xe   : > { %p113_p11 = scmp.lt.s32.totalorder %s559_s14, 3  ;;  %s125_s25 = sshll.u32 %s732_s0, 4  ;;  %s126_s25 = int_to_ptr.hbm [resolvable:$true] %s125_s25 }
   0xf   : > { %p334_p13 = scmp.ge.s32.totalorder %s559_s14, 2  ;;  %p372_p0 = scmp.lt.s32.totalorder %s559_s14, 2 }
  0x10   : > { %p646_p12 = pnand %p332_p10, %p113_p11  ;;  %s31_s28 = sadd.s32 1, %s555_s13 }
  0x11   : > { %p656_p2 = pnand %p372_p0, %p623_p5  ;;  %p33_p6 = scmp.ge.s32.totalorder %s31_s28, 2 }
  0x12   : > { %p359_p1 = pneg %p646_p12  ;;  %s136_s29 = sand.u32 1, %s547_s11  }
  0x13   : > { %s561_s30 = smov [#allocation2]   ;;  %s748_s28 = smov (%p33_p6, %s31_s28), 0 }
  0x14   : > { %p360_p4 = pnand %p359_p1, %p619_p3  ;;  %s347_s3 = smul.u32 6, %s136_s29 }
  0x15   : > { %s56_s4 = ssub.s32 %s555_s13, %s748_s28  ;;  %s348_s5 = smul.u32 6, %s555_s13 }
  0x16   : > { %362 = dma.hbm_to_smem (!%p360_p4), %s126_s25, 16, %s561_s30, [#allocation5]  }
  0x17   : > { %p59_p10 = scmp.eq.s32.totalorder %s56_s4, 0  ;;  %s146_s8 = scalar_lea.hbm %s733_s1, %s348_s5 }
  0x18   : > { %s140_s15 = scalar_lea.vmem [#allocation6], %s347_s3  ;;  %s147_s23 = sshll.u32 %s146_s8, 4  ;;  %s148_s23 = int_to_ptr.hbm [resolvable:$true] %s147_s23 }
  0x19   : > { %s149_s16 = sshll.u32 %s140_s15, 4  ;;  %s137_s24 = scalar_lea.sflag [#allocation3], %s136_s29  ;;  %s150_s16 = int_to_ptr.vmem [resolvable:$true] %s149_s16 }
  0x1a   : > { %s675_s19 = scalar_select %p59_p10, %s547_s11, %s61_s17  }
  0x1b   : > { %s562_s25 = smov 32   ;;  %s563_s30 = smov 2  }
  0x1c   : > { %366 = dma.hbm_to_vmem [thread:$0]  (!%p656_p2), %s148_s23, 96, %s150_s16, %s137_s24, %s562_s25, %s562_s25, %s563_s30  }
  0x1d   : > { %161 = sbr.rel (%p646_p12) target bundleno = 62 (0x3e), region = 28 }
  0x22   : > { %526 = dma.done.wait (%p619_p3), [#allocation5], 16  }
  0x23   : > { %528 = vsyncadd (%p619_p3), [#allocation5], 4294967280  ;;  %s686_s17 = sand.u32 1, %s543_s10  }
  0x24   : > { %s349_s29 = smul.u32 6, %s686_s17  ;;  %s169_s3 = scalar_lea.sflag [#allocation3], %s686_s17 }
  0x26   : > { %s172_s4 = scalar_lea.vmem [#allocation6], %s349_s29 }
  0x27   : > { %530 = dma.done.wait (%p629_p7), %s169_s3, 96  }
  0x28   : > { %532 = vsyncadd (%p629_p7), %s169_s3, 4294967200 }
  0x29   : > { %178 = sfence }
  0x2a   : > { %s195_s26 = sld [smem:[#allocation2]]  ;;  %v198_v0 = vld [vmem:[%s172_s4] sm:$0x3]  ;;  %s350_s5 = smul.u32 6, %s551_s12  ;;  %v340_v1 = vld [vmem:[%s172_s4 + $0x2] sm:$0x3] }
  0x2b   : > { %s338_s27 = sld [smem:[#allocation2 + $0x1]]  ;;  %v341_v2 = vld [vmem:[%s172_s4 + $0x4] sm:$0x3]  ;;  %s194_s8 = scalar_lea.vmem [#allocation7], %s349_s29 }
  0x2c   : > { %s339_s18 = sld [smem:[#allocation2 + $0x2]]  ;;  %s229_s20 = scalar_lea.hbm %s734_s2, %s350_s5 }
  0x2d   : > { %s230_s15 = sshll.u32 %s194_s8, 4  ;;  %s232_s16 = sshll.u32 %s229_s20, 4  ;;  %s231_s15 = int_to_ptr.vmem [resolvable:$true] %s230_s15  ;;  %s233_s16 = int_to_ptr.hbm [resolvable:$true] %s232_s16 }
  0x2e   : > { %s217_s12 = scalar_lea.sflag [#allocation4], %s686_s17  ;;  %s487_s23 = sshra.s32 %s233_s16, 4  ;;  %s488_s23 = int_to_ptr.hbm [resolvable:$true] %s487_s23 }
  0x2f   : > { %s489_s24 = scalar_lea.hbm %s488_s23, 6  ;;  %s493_s29 = scalar_lea.hbm %s734_s2, 12 }
  0x30   : > { %v203_v3 = vstv %s195_s26  ;;  %p490_p3 = scmp.ne.s32.totalorder %s488_s23, %s489_s24  ;;  %p494_p11 = scmp.lt.s32.totalorder %s488_s23, %s734_s2 }
  0x31   : > { %v204_v4 = vmul.f32 %v203_v3, %v198_v0  ;;  %v205_v5 = vstv %s338_s27  ;;  %p495_p12 = scmp.lt.s32.totalorder %s493_s29, %s489_s24 }
  0x32   : > { %v206_v6 = vmul.f32 %v340_v1, %v205_v5  ;;  %v208_v7 = vstv %s339_s18  ;;  %p491_p5 = pnand %p490_p3, %p633_p8 }
  0x33   : > { %v209_v8 = vmul.f32 %v341_v2, %v208_v7  ;;  %p496_p0 = por %p495_p12, %p494_p11 }
  0x34   : > { %v207_v9 = vadd.f32 %v206_v6, %v204_v4  ;;  %p492_p7 = pneg %p491_p5 }
  0x36   : > { %v210_v10 = vadd.f32 %v209_v8, %v207_v9  ;;  %p497_p1 = pnand %p496_p0, %p492_p7 }
  0x38   : > { %211 = vst [vmem:[%s194_s8] sm:$0x3] %v210_v10 }
  0x39   : > { %342 = vst [vmem:[%s194_s8 + $0x2] sm:$0x3] %v210_v10 }
  0x3a   : > { %343 = vst [vmem:[%s194_s8 + $0x4] sm:$0x3] %v210_v10 }
  0x3b   : > { %500 = shalt.err (!%p497_p1)
}
  0x3c   : > { %s564_s17 = smov 32   ;;  %s565_s26 = smov 2  }
  0x3d   : > { %357 = dma.vmem_to_hbm [thread:$0]  (%p633_p8), %s231_s15, 96, %s233_s16, %s217_s12, %s564_s17, %s564_s17, %s565_s26  }
  0x3e PF: > { %s247_s27 = sand.u32 1, %s539_s9   ;;  %p368_p2 = pnand %p334_p13, %p637_p9 }
  0x3f   : > { %s248_s18 = scalar_lea.sflag [#allocation4], %s247_s27 }
  0x40   : > { %p369_p4 = pneg %p368_p2 }
  0x42   : > { %534 = dma.done.wait (%p369_p4), %s248_s18, 96  }
  0x43   : > { %536 = vsyncadd (%p369_p4), %s248_s18, 4294967200  ;;  %s19_s14 = sadd.s32 1, %s559_s14   ;;  %s742_s9 = smov %s543_s10 }
  0x44   : > { %p16_p6 = scmp.ge.s32.totalorder %s19_s14, 4   ;;  %s743_s10 = smov %s547_s11 }
  0x45   : > { %s744_s11 = smov %s675_s19  ;;  %s745_s12 = smov %s555_s13 }
  0x46   : > { %s746_s13 = smov %s748_s28  ;;  %18 = sbr.rel (!%p16_p6) target bundleno = 7 (0x7), region = 82 }
  0x4b   :  { %254 = vsyncpa [#allocation3], 1 }
  0x4c   :  { %256 = vsyncpa [#allocation3 + $0x1], 1 }
  0x4d   :  { %257 = vsyncpa [#allocation4], 1 }
  0x4e   :  { %259 = vsyncpa [#allocation4 + $0x1], 1 }
  0x4f   :  { %260 = vsyncpa [#allocation5], 1 }
  0x50   :  { %262 = vsyncpa [#allocation5 + $0x1], 1 }

</bundles_post_ra>
